<compile_context>
chip_gen: v7x
topology: tpu7x:2x2x1
jax: 0.10.0
libtpu: 0.0.40
codegen_flags: <defaults>
</compile_context>

<pallas_src>
import functools

import jax
import jax.numpy as jnp
from jax.experimental import pallas as pl
from jax.experimental.pallas import tpu as pltpu


# ----------------------------- Pallas kernel --------------------------------
def _sgp_kernel(*refs, k, n_nodes, mode, global_attr):
    """Single-invocation kernel; everything whole-resident in VMEM.

    refs (mode == "bi_fused"): x [N, BFp], a_stk [2N, N], a_blk [2N, 2N], o [C, N, BFp]
    refs (mode == "bi_split"): x [N, BFp], a_fwd [N, N],  a_bwd [N, N],   o [C, N, BFp]
    refs (mode == "uni")     : x [N, BFp], a_fwd [N, N],                  o [C, N, BFp]
    Chunk layout along o's first axis: [identity, fwd 1..k, (bwd 1..k), (global)].
    """
    N = n_nodes
    if mode == "bi_fused":
        x_ref, a_stk_ref, a_blk_ref, o_ref = refs
    elif mode == "bi_split":
        x_ref, a_fwd_ref, a_bwd_ref, o_ref = refs
    else:  # "uni"
        x_ref, a_fwd_ref, o_ref = refs

    x = x_ref[...]                                   # [N, BFp] f32
    o_ref[0] = x.astype(o_ref.dtype)                 # chunk 0: identity (streamed now)

    if global_attr:
        # Node-mean (XLU reduce) computed once; written immediately so its
        # store retires while the hop chain runs.
        g = jnp.mean(x, axis=0, keepdims=True)       # [1, BFp]
        o_ref[o_ref.shape[0] - 1] = jnp.broadcast_to(g, x.shape).astype(o_ref.dtype)

    if mode == "bi_fused":
        # Fused fwd/bwd chain: one matmul per hop on the stacked state.
        a_stk = a_stk_ref[...]                       # [2N, N]
        s = jnp.dot(a_stk, x, preferred_element_type=jnp.float32)      # [2N, BFp]
        o_ref[1] = s[:N].astype(o_ref.dtype)
        o_ref[1 + k] = s[N:].astype(o_ref.dtype)
        if k > 1:
            a_blk = a_blk_ref[...]                   # [2N, 2N] block-diag
            for h in range(2, k + 1):
                s = jnp.dot(a_blk, s, preferred_element_type=jnp.float32)
                o_ref[h] = s[:N].astype(o_ref.dtype)
                o_ref[h + k] = s[N:].astype(o_ref.dtype)
    else:
        a_fwd = a_fwd_ref[...]                       # [N, N]
        cur = x
        for h in range(1, k + 1):
            cur = jnp.dot(a_fwd, cur, preferred_element_type=jnp.float32)
            o_ref[h] = cur.astype(o_ref.dtype)       # streamed as produced
        if mode == "bi_split":
            a_bwd = a_bwd_ref[...]
            cur = x
            for h in range(1, k + 1):
                cur = jnp.dot(a_bwd, cur, preferred_element_type=jnp.float32)
                o_ref[k + h] = cur.astype(o_ref.dtype)


# ------------------------------- glue (JAX) ---------------------------------
def _dense_adj(edge_index, edge_weight, num_nodes):
    """A[t, s] = weight of edge s -> t (so propagation is x' = A @ x)."""
    src, dst = edge_index[0], edge_index[1]
    a = jnp.zeros((num_nodes, num_nodes), jnp.float32)
    return a.at[dst, src].add(edge_weight.astype(jnp.float32))


def _asym_normalize(a):
    """Asymmetric (in-degree) normalization: row-normalize A[t, :]."""
    deg = a.sum(axis=1, keepdims=True)
    safe = jnp.where(deg > 0, deg, 1.0)
    return jnp.where(deg > 0, a / safe, 0.0)


def sgp_spatial_encoder(x, edge_index, edge_weight, *, receptive_field,
                        bidirectional, undirected, global_attr,
                        add_self_loops=False):
    """Pallas implementation of SGPSpatialEncoder.forward.

    x:           [B, N, F] float32
    edge_index:  [2, E] int32   (row 0 = source, row 1 = target)
    edge_weight: [E]    float32
    returns:     [B, N, F * C]
    """
    B, N, F = x.shape
    k = receptive_field

    w = _dense_adj(edge_index, edge_weight, N)               # W[t, s]
    if undirected:
        w = w + w.T
    if add_self_loops:
        w = w + jnp.eye(N, dtype=jnp.float32)

    # Small-N path: keep adjacency in f32 (MXU idle at this size; bf16 would
    # only lose accuracy).  The large-N tiled path (see TODO above) is where
    # bf16 adjacency actually pays for itself.
    a_fwd = _asym_normalize(w)
    a_bwd = _asym_normalize(w.T) if bidirectional else None

    # Fold batch into the lane (feature) axis and pad lanes to a multiple of
    # 128 so every vreg along the hop-state path is full and stores unmasked.
    BF = B * F
    BFp = max(128, ((BF + 127) // 128) * 128)
    x_wide = jnp.transpose(x, (1, 0, 2)).reshape(N, BF)
    if BFp != BF:
        x_wide = jnp.pad(x_wide, ((0, 0), (0, BFp - BF)))

    # Fuse the two directional chains into one matmul per hop while the stacked
    # LHS still fits comfortably in an MXU tile.
    fuse = bidirectional and (2 * N <= 128) and (N % 8 == 0)
    if fuse:
        a_stk = jnp.concatenate([a_fwd, a_bwd], axis=0)                  # [2N, N]
        zeros = jnp.zeros((N, N), jnp.float32)
        a_blk = jnp.concatenate(
            [jnp.concatenate([a_fwd, zeros], axis=1),
             jnp.concatenate([zeros, a_bwd], axis=1)], axis=0)           # [2N, 2N]
        inputs = [x_wide, a_stk, a_blk]
        mode = "bi_fused"
    elif bidirectional:
        inputs = [x_wide, a_fwd, a_bwd]
        mode = "bi_split"
    else:
        inputs = [x_wide, a_fwd]
        mode = "uni"

    n_chunks = 1 + k * (2 if bidirectional else 1) + int(global_attr)

    kernel = functools.partial(_sgp_kernel, k=k, n_nodes=N, mode=mode,
                               global_attr=global_attr)

    # Everything is whole-resident: memory-space-only BlockSpecs (no grid),
    # i.e. single-buffered VMEM residency with zero grid-step overhead.
    vmem_spec = pl.BlockSpec(memory_space=pltpu.MemorySpace.VMEM)

    out_cm = pl.pallas_call(
        kernel,
        out_shape=jax.ShapeDtypeStruct((n_chunks, N, BFp), x.dtype),
        in_specs=[vmem_spec] * len(inputs),
        out_specs=vmem_spec,
        compiler_params=pltpu.CompilerParams(
            # Raise the scoped VMEM limit (v5e default is only 16 MiB) so the
            # whole-resident design keeps working at moderate N; 64 MiB is
            # within physical VMEM on all of v5e/v6e/v7x.
            vmem_limit_bytes=64 * 1024 * 1024),
    )(*inputs)                                                # [C, N, BFp]

    # Un-fold (b, f) lanes and the chunk-major layout in XLA (tiny transpose).
    out_cm = out_cm[:, :, :BF]
    out = out_cm.reshape(n_chunks, N, B, F)
    out = jnp.transpose(out, (2, 1, 0, 3)).reshape(B, N, n_chunks * F)
    return out


# ---------------------------- pure-JAX reference ----------------------------
def _reference(x, edge_index, edge_weight, *, receptive_field, bidirectional,
               undirected, global_attr, add_self_loops=False):
    B, N, F = x.shape
    w = _dense_adj(edge_index, edge_weight, N)
    if undirected:
        w = w + w.T
    if add_self_loops:
        w = w + jnp.eye(N, dtype=jnp.float32)
    a_fwd = _asym_normalize(w)
    hp = jax.lax.Precision.HIGHEST
    outs = [x]
    cur = x
    for _ in range(receptive_field):
        cur = jnp.einsum('ts,bsf->btf', a_fwd, cur, precision=hp)
        outs.append(cur)
    if bidirectional:
        a_bwd = _asym_normalize(w.T)
        cur = x
        for _ in range(receptive_field):
            cur = jnp.einsum('ts,bsf->btf', a_bwd, cur, precision=hp)
            outs.append(cur)
    if global_attr:
        outs.append(jnp.ones_like(x) * x.mean(axis=-2, keepdims=True))
    return jnp.concatenate(outs, axis=-1)


# ---------------------------------- main -------------------------------------
if __name__ == "__main__":
    # Module config (no learnable parameters in SGPSpatialEncoder).
    RECEPTIVE_FIELD = 2
    BIDIRECTIONAL = True
    UNDIRECTED = False
    GLOBAL_ATTR = True
    ADD_SELF_LOOPS = False

    B, N, F, E = 2, 16, 32, 48

    key = jax.random.PRNGKey(0)
    kx, ksrc, kdst, kw = jax.random.split(key, 4)
    x = jax.random.normal(kx, (B, N, F), dtype=jnp.float32)
    edge_index = jnp.stack([
        jax.random.randint(ksrc, (E,), 0, N, dtype=jnp.int32),
        jax.random.randint(kdst, (E,), 0, N, dtype=jnp.int32),
    ], axis=0)
    edge_weight = jax.random.uniform(kw, (E,), dtype=jnp.float32) + 0.1

    out = sgp_spatial_encoder(
        x, edge_index, edge_weight,
        receptive_field=RECEPTIVE_FIELD, bidirectional=BIDIRECTIONAL,
        undirected=UNDIRECTED, global_attr=GLOBAL_ATTR,
        add_self_loops=ADD_SELF_LOOPS)
    out = jax.block_until_ready(out)

    ref = _reference(
        x, edge_index, edge_weight,
        receptive_field=RECEPTIVE_FIELD, bidirectional=BIDIRECTIONAL,
        undirected=UNDIRECTED, global_attr=GLOBAL_ATTR,
        add_self_loops=ADD_SELF_LOOPS)

    expected_chunks = 1 + RECEPTIVE_FIELD * (2 if BIDIRECTIONAL else 1) + int(GLOBAL_ATTR)
    assert out.shape == (B, N, F * expected_chunks), out.shape
    # f32 adjacency + f32 hop state now; tolerance only needs to absorb MXU
    # matmul pass precision, much tighter than the old bf16 path.
    assert jnp.allclose(out, ref, atol=5e-3, rtol=5e-3), "mismatch vs reference"

    print("KERNEL_OK")
</pallas_src>

<mosaic_0001>
module attributes {stable_mosaic.version = 11 : i64} {
  func.func @_sgp_kernel(%arg0: memref<16x128xf32, #tpu.memory_space<vmem>>, %arg1: memref<32x16xf32, #tpu.memory_space<vmem>>, %arg2: memref<32x32xf32, #tpu.memory_space<vmem>>, %arg3: memref<6x16x128xf32, #tpu.memory_space<vmem>>) attributes {dimension_semantics = [], scalar_prefetch = 0 : i64, scratch_operands = 0 : i64, tpu.core_type = #tpu.core_type<tc>} {
    %c0 = arith.constant 0 : index
    %c0_0 = arith.constant 0 : index
    %0 = vector.load %arg0[%c0, %c0_0] : memref<16x128xf32, #tpu.memory_space<vmem>>, vector<16x128xf32>
    %c0_1 = arith.constant 0 : index
    %c0_2 = arith.constant 0 : index
    %c0_3 = arith.constant 0 : index
    %1 = vector.load %arg3[%c0_1, %c0_2, %c0_3] : memref<6x16x128xf32, #tpu.memory_space<vmem>>, vector<1x16x128xf32>
    %2 = vector.shape_cast %1 : vector<1x16x128xf32> to vector<16x128xf32>
    %3 = vector.shape_cast %0 : vector<16x128xf32> to vector<1x16x128xf32>
    tpu.vector_store %arg3[%c0_1, %c0_2, %c0_3], %3 {strides = array<i32>} : memref<6x16x128xf32, #tpu.memory_space<vmem>>, vector<1x16x128xf32>,
    %cst = arith.constant dense<0.000000e+00> : vector<128xf32>
    %4 = vector.multi_reduction <add>, %0, %cst [0] : vector<16x128xf32> to vector<128xf32>
    %5 = vector.shape_cast %4 : vector<128xf32> to vector<1x128xf32>
    %cst_4 = arith.constant 1.600000e+01 : f32
    %6 = vector.broadcast %cst_4 : f32 to vector<1x128xf32>
    %7 = arith.divf %5, %6 : vector<1x128xf32>
    %8 = vector.shape_cast %7 : vector<1x128xf32> to vector<1x128xf32>
    %9 = vector.broadcast %8 : vector<1x128xf32> to vector<16x128xf32>
    %c5 = arith.constant 5 : index
    %c0_5 = arith.constant 0 : index
    %c0_6 = arith.constant 0 : index
    %10 = vector.load %arg3[%c5, %c0_5, %c0_6] : memref<6x16x128xf32, #tpu.memory_space<vmem>>, vector<1x16x128xf32>
    %11 = vector.shape_cast %10 : vector<1x16x128xf32> to vector<16x128xf32>
    %12 = vector.shape_cast %9 : vector<16x128xf32> to vector<1x16x128xf32>
    tpu.vector_store %arg3[%c5, %c0_5, %c0_6], %12 {strides = array<i32>} : memref<6x16x128xf32, #tpu.memory_space<vmem>>, vector<1x16x128xf32>,
    %c0_7 = arith.constant 0 : index
    %c0_8 = arith.constant 0 : index
    %13 = vector.load %arg1[%c0_7, %c0_8] : memref<32x16xf32, #tpu.memory_space<vmem>>, vector<32x16xf32>
    %cst_9 = arith.constant dense<0.000000e+00> : vector<32x128xf32>
    %14 = tpu.matmul %13, %0, %cst_9 {dimension_numbers = #tpu.dot_dimension_numbers<[1], [0], [0], [1], [0, 0, 1, 1], [], []>} : vector<32x16xf32>, vector<16x128xf32>, vector<32x128xf32> -> vector<32x128xf32>
    %15 = vector.extract_strided_slice %14 {offsets = [0, 0], sizes = [16, 128], strides = [1, 1]} : vector<32x128xf32> to vector<16x128xf32>
    %c1 = arith.constant 1 : index
    %c0_10 = arith.constant 0 : index
    %c0_11 = arith.constant 0 : index
    %16 = vector.load %arg3[%c1, %c0_10, %c0_11] : memref<6x16x128xf32, #tpu.memory_space<vmem>>, vector<1x16x128xf32>
    %17 = vector.shape_cast %16 : vector<1x16x128xf32> to vector<16x128xf32>
    %18 = vector.shape_cast %15 : vector<16x128xf32> to vector<1x16x128xf32>
    tpu.vector_store %arg3[%c1, %c0_10, %c0_11], %18 {strides = array<i32>} : memref<6x16x128xf32, #tpu.memory_space<vmem>>, vector<1x16x128xf32>,
    %19 = vector.extract_strided_slice %14 {offsets = [16, 0], sizes = [16, 128], strides = [1, 1]} : vector<32x128xf32> to vector<16x128xf32>
    %c3 = arith.constant 3 : index
    %c0_12 = arith.constant 0 : index
    %c0_13 = arith.constant 0 : index
    %20 = vector.load %arg3[%c3, %c0_12, %c0_13] : memref<6x16x128xf32, #tpu.memory_space<vmem>>, vector<1x16x128xf32>
    %21 = vector.shape_cast %20 : vector<1x16x128xf32> to vector<16x128xf32>
    %22 = vector.shape_cast %19 : vector<16x128xf32> to vector<1x16x128xf32>
    tpu.vector_store %arg3[%c3, %c0_12, %c0_13], %22 {strides = array<i32>} : memref<6x16x128xf32, #tpu.memory_space<vmem>>, vector<1x16x128xf32>,
    %c0_14 = arith.constant 0 : index
    %c0_15 = arith.constant 0 : index
    %23 = vector.load %arg2[%c0_14, %c0_15] : memref<32x32xf32, #tpu.memory_space<vmem>>, vector<32x32xf32>
    %cst_16 = arith.constant dense<0.000000e+00> : vector<32x128xf32>
    %24 = tpu.matmul %23, %14, %cst_16 {dimension_numbers = #tpu.dot_dimension_numbers<[1], [0], [0], [1], [0, 0, 1, 1], [], []>} : vector<32x32xf32>, vector<32x128xf32>, vector<32x128xf32> -> vector<32x128xf32>
    %25 = vector.extract_strided_slice %24 {offsets = [0, 0], sizes = [16, 128], strides = [1, 1]} : vector<32x128xf32> to vector<16x128xf32>
    %c2 = arith.constant 2 : index
    %c0_17 = arith.constant 0 : index
    %c0_18 = arith.constant 0 : index
    %26 = vector.load %arg3[%c2, %c0_17, %c0_18] : memref<6x16x128xf32, #tpu.memory_space<vmem>>, vector<1x16x128xf32>
    %27 = vector.shape_cast %26 : vector<1x16x128xf32> to vector<16x128xf32>
    %28 = vector.shape_cast %25 : vector<16x128xf32> to vector<1x16x128xf32>
    tpu.vector_store %arg3[%c2, %c0_17, %c0_18], %28 {strides = array<i32>} : memref<6x16x128xf32, #tpu.memory_space<vmem>>, vector<1x16x128xf32>,
    %29 = vector.extract_strided_slice %24 {offsets = [16, 0], sizes = [16, 128], strides = [1, 1]} : vector<32x128xf32> to vector<16x128xf32>
    %c4 = arith.constant 4 : index
    %c0_19 = arith.constant 0 : index
    %c0_20 = arith.constant 0 : index
    %30 = vector.load %arg3[%c4, %c0_19, %c0_20] : memref<6x16x128xf32, #tpu.memory_space<vmem>>, vector<1x16x128xf32>
    %31 = vector.shape_cast %30 : vector<1x16x128xf32> to vector<16x128xf32>
    %32 = vector.shape_cast %29 : vector<16x128xf32> to vector<1x16x128xf32>
    tpu.vector_store %arg3[%c4, %c0_19, %c0_20], %32 {strides = array<i32>} : memref<6x16x128xf32, #tpu.memory_space<vmem>>, vector<1x16x128xf32>,
    return
  }
}

</mosaic_0001>

<bundles_post_ra>
// kernel: tpu_custom_call.1
= control target key start
LH: loop header
LB: loop body
LE: loop exit
PB: predicated region body
PF: predicated region fallthrough
CT: control target
= control target key end

     0   :  { %8 = vsyncpa [#allocation3], 0  ;;  %s565_s0 = inlined_call_operand.hbm [shape: f32[16,128], index: 0, kind: input, shape index: {}]   ;;  %s566_s1 = inlined_call_operand.hbm [shape: f32[32,16], index: 1, kind: input, shape index: {}]   ;;  %s567_s2 = inlined_call_operand.hbm [shape: f32[32,32], index: 2, kind: input, shape index: {}]   ;;  %s568_s3 = inlined_call_operand.hbm [shape: f32[6,16,128], index: 3, kind: output, shape index: {}]  }
   0x1   :  { %9 = vsyncpa [#allocation6], 0 }
   0x2   :  { %10 = vsyncpa [#allocation4], 0  ;;  %s464_s12 = smov [#allocation5]   ;;  %s465_s14 = smov [#allocation2]  }
   0x3   :  { %s28_s13 = sshll.u32 %s464_s12, 4  ;;  %s16_s15 = sshll.u32 %s465_s14, 4  ;;  %s29_s13 = int_to_ptr.vmem [resolvable:$true] %s28_s13  ;;  %s490_s15 = int_to_ptr.vmem [resolvable:$true] %s16_s15 }
   0x4   :  { %s370_s18 = scalar_lea.hbm %s566_s1, 512 }
   0x5   :  { %p371_p0 = scmp.ne.s32.totalorder %s566_s1, %s370_s18  ;;  %p374_p1 = scmp.lt.u32.totalorder %s370_s18, %s566_s1 }
   0x7   :  { %p376_p2 = pnand %p374_p1, %p371_p0 }
   0x9   :  { %379 = shalt.err (!%p376_p2)
}
   0xa   :  { %s380_s23 = scalar_lea.vmem %s29_s13, 512  ;;  %p385_p4 = scmp.lt.s32.totalorder %s29_s13, %s29_s13 }
   0xb   :  { %p381_p3 = scmp.ne.s32.totalorder %s29_s13, %s380_s23  ;;  %p386_p5 = scmp.lt.s32.totalorder %s380_s23, %s380_s23 }
   0xd   :  { %p387_p6 = por %p386_p5, %p385_p4 }
   0xf   :  { %p388_p7 = pnand %p387_p6, %p381_p3 }
  0x11   :  { %391 = shalt.err (!%p388_p7)
}
  0x12   :  { %s466_s24 = smov 128   ;;  %s467_s25 = smov 8  }
  0x13   :  { %34 = dma.hbm_to_vmem [thread:$0]  %s566_s1, 512, %s29_s13, [#allocation6], %s466_s24, %s466_s24, %s467_s25  }
  0x14   :  { %s392_s30 = scalar_lea.hbm %s565_s0, 256 }
  0x15   :  { %p393_p8 = scmp.ne.s32.totalorder %s565_s0, %s392_s30  ;;  %p396_p9 = scmp.lt.u32.totalorder %s392_s30, %s565_s0 }
  0x17   :  { %p398_p10 = pnand %p396_p9, %p393_p8 }
  0x19   :  { %401 = shalt.err (!%p398_p10)
}
  0x1a   :  { %s402_s8 = scalar_lea.vmem %s490_s15, 256  ;;  %p407_p12 = scmp.lt.s32.totalorder %s490_s15, %s490_s15 }
  0x1b   :  { %p403_p11 = scmp.ne.s32.totalorder %s490_s15, %s402_s8  ;;  %p408_p13 = scmp.lt.s32.totalorder %s402_s8, %s402_s8 }
  0x1d   :  { %p409_p0 = por %p408_p13, %p407_p12 }
  0x1f   :  { %p410_p1 = pnand %p409_p0, %p403_p11 }
  0x21   :  { %413 = shalt.err (!%p410_p1)
}
  0x22   :  { %22 = dma.hbm_to_vmem [thread:$0]  %s565_s0, 256, %s490_s15, [#allocation3], %s466_s24, %s466_s24, %s467_s25  }
  0x23   :  { %s468_s10 = smov [#allocation7]   ;;  %s414_s14 = scalar_lea.hbm %s567_s2, 512 }
  0x24   :  { %s40_s11 = sshll.u32 %s468_s10, 4  ;;  %p415_p2 = scmp.ne.s32.totalorder %s567_s2, %s414_s14  ;;  %s41_s11 = int_to_ptr.vmem [resolvable:$true] %s40_s11 }
  0x25   :  { %p418_p3 = scmp.lt.u32.totalorder %s414_s14, %s567_s2 }
  0x27   :  { %p420_p4 = pnand %p418_p3, %p415_p2 }
  0x29   :  { %423 = shalt.err (!%p420_p4)
}
  0x2a   :  { %s424_s20 = scalar_lea.vmem %s41_s11, 512  ;;  %p429_p6 = scmp.lt.s32.totalorder %s41_s11, %s41_s11 }
  0x2b   :  { %p425_p5 = scmp.ne.s32.totalorder %s41_s11, %s424_s20  ;;  %p430_p7 = scmp.lt.s32.totalorder %s424_s20, %s424_s20 }
  0x2d   :  { %p431_p8 = por %p430_p7, %p429_p6 }
  0x2f   :  { %p432_p9 = pnand %p431_p8, %p425_p5 }
  0x31   :  { %435 = shalt.err (!%p432_p9)
}
  0x32   :  { %46 = dma.hbm_to_vmem [thread:$0]  %s567_s2, 512, %s41_s11, [#allocation6], %s466_s24, %s466_s24, %s467_s25  }
  0x33   :  { %458 = dma.done.wait [#allocation3], 256  }
  0x34   :  { %459 = vsyncadd [#allocation3], 4294967040 }
  0x35   :  { %460 = dma.done.wait [#allocation6], 1024  }
  0x36   :  { %461 = vsyncadd [#allocation6], 4294966272  ;;  %vm76_vm0 = vcmask 130048   ;;  %v56_v0 = vld [vmem:[#allocation2] sm:$0xff]  ;;  %v57_v1 = vld [vmem:[#allocation2 + $0x8] sm:$0xff]  ;;  %vm184_vm1 = vcmask 261120  }
  0x37   :  { %v72_v2 = vld [vmem:[#allocation5] sm:$0xff]  ;;  %58 = vst [vmem:[#allocation8] sm:$0xff] %v56_v0  ;;  %59 = vst [vmem:[#allocation8 + $0x8] sm:$0xff] %v57_v1  ;;  %v60_v3 = vadd.f32 %v57_v1, %v56_v0  ;;  %v352_v4 = vpack.c.bf16 %v57_v1, %v56_v0  ;;  %v73_v6 = vld [vmem:[#allocation5 + $0x8] sm:$0xff]  ;;  %s469_s2 = smov [#allocation8]  }
  0x38   :  { %332 = vmatprep.mubr.msk.f32.mxu0 %vm76_vm0, %v72_v2  ;;  %v74_v8 = vld [vmem:[#allocation5 + $0x10] sm:$0xff]  ;;  %v75_v10 = vld [vmem:[#allocation5 + $0x18] sm:$0xff]  ;;  %v180_v15 = vld [vmem:[#allocation7] sm:$0xff]  ;;  %s293_s21 = sshll.u32 %s469_s2, 4  ;;  %s294_s21 = int_to_ptr.vmem [resolvable:$true] %s293_s21 }
  0x39   :  { %v61_v5 = vrot.slane %v60_v3, 4  ;;  %353 = vmatprep.subr.bf16.mxu0 %v352_v4  ;;  %346 = vmatprep.mubr.msk.f32.mxu1 %vm184_vm1, %v180_v15  ;;  %v181_v22 = vld [vmem:[#allocation7 + $0x8] sm:$0xff]  ;;  %v182_v23 = vld [vmem:[#allocation7 + $0x10] sm:$0xff]  ;;  %v183_v24 = vld [vmem:[#allocation7 + $0x18] sm:$0xff]  ;;  %s436_s22 = scalar_lea.vmem %s294_s21, 1536  ;;  %p441_p11 = scmp.lt.s32.totalorder %s294_s21, %s294_s21 }
  0x3a   :  { %355 = vmatpush3.bf16.msra.mxu0 %v352_v4  ;;  %p437_p10 = scmp.ne.s32.totalorder %s294_s21, %s436_s22  ;;  %p442_p12 = scmp.lt.s32.totalorder %s436_s22, %s436_s22 }
  0x3b   :  { %v62_v7 = vadd.f32 %v61_v5, %v60_v3 }
  0x3c   :  { %p443_p13 = por %p442_p12, %p441_p11 }
  0x3d   :  { %v63_v9 = vrot.slane %v62_v7, 2  ;;  %333 = vmatmul.mubr.msk.f32.vlgmr.msra.gmra.mrb[0].mxu0 %vm76_vm0, %v73_v6 }
  0x3e   :  { %335 = vmatprep.mubr.msk.f32.mxu0 %vm76_vm0, %v74_v8  ;;  %p444_p0 = pnand %p443_p13, %p437_p10 }
  0x3f   :  { %v64_v11 = vadd.f32 %v63_v9, %v62_v7 }
  0x41   :  { %v65_v12 = vrot.slane %v64_v11, 1  ;;  %336 = vmatmul.mubr.msk.f32.gmra.mrb[2].mxu0 %vm76_vm0, %v75_v10 }
  0x43   :  { %v66_v13 = vadd.f32 %v65_v12, %v64_v11 }
  0x45   :  { %v68_v14 = vmul.f32 0.0625, %v66_v13 }
  0x47   :  { %70 = vst [vmem:[#allocation8 + $0x50] sm:$0xff] %v68_v14  ;;  %71 = vst [vmem:[#allocation8 + $0x58] sm:$0xff] %v68_v14 }
 0x110   :  { %v334_v16 = vpop.f32.mrb[0].mxu0 }
 0x111   :  { %176 = vst [vmem:[#allocation8 + $0x18] sm:$0xff] %v334_v16  ;;  %v155_v17 = vpop.f32.mrb[1].mxu0 }
 0x112   :  { %175 = vst [vmem:[#allocation8 + $0x10] sm:$0xff] %v155_v17  ;;  %v356_v18 = vpack.c.bf16 %v334_v16, %v155_v17 }
 0x114   :  { %v337_v19 = vpop.f32.mrb[2].mxu0  ;;  %357 = vmatprep.subr.bf16.mxu1 %v356_v18 }
 0x115   :  { %179 = vst [vmem:[#allocation8 + $0x38] sm:$0xff] %v337_v19  ;;  %v165_v20 = vpop.f32.mrb[3].mxu0  ;;  %359 = vmatpush3.bf16.msra.mxu1 %v356_v18 }
 0x116   :  { %178 = vst [vmem:[#allocation8 + $0x30] sm:$0xff] %v165_v20  ;;  %v360_v21 = vpack.c.bf16 %v337_v19, %v165_v20 }
 0x118   :  { %361 = vmatprep.subr.bf16.mxu1 %v360_v21 }
 0x119   :  { %363 = vmatpush3.bf16.msra.mxu1 %v360_v21 }
 0x11c   :  { %347 = vmatmul.mubr.msk.f32.vlgmr.msra.gmra.mrb[0].mxu1 %vm184_vm1, %v181_v22 }
 0x11d   :  { %349 = vmatprep.mubr.msk.f32.mxu1 %vm184_vm1, %v182_v23 }
 0x120   :  { %350 = vmatmul.mubr.msk.f32.gmra.mrb[2].mxu1 %vm184_vm1, %v183_v24 }
 0x1ef   :  { %v348_v25 = vpop.f32.mrb[0].mxu1 }
 0x1f0   :  { %284 = vst [vmem:[#allocation8 + $0x28] sm:$0xff] %v348_v25  ;;  %v263_v26 = vpop.f32.mrb[1].mxu1 }
 0x1f1   :  { %283 = vst [vmem:[#allocation8 + $0x20] sm:$0xff] %v263_v26 }
 0x1f3   :  { %v351_v27 = vpop.f32.mrb[2].mxu1 }
 0x1f4   :  { %287 = vst [vmem:[#allocation8 + $0x48] sm:$0xff] %v351_v27  ;;  %v273_v28 = vpop.f32.mrb[3].mxu1 }
 0x1f5   :  { %286 = vst [vmem:[#allocation8 + $0x40] sm:$0xff] %v273_v28 }
 0x1f6   :  { %447 = shalt.err (!%p444_p0)
}
 0x1f7   :  { %s448_s27 = scalar_lea.hbm %s568_s3, 1536 }
 0x1f8   :  { %p449_p1 = scmp.ne.s32.totalorder %s568_s3, %s448_s27  ;;  %p452_p2 = scmp.lt.u32.totalorder %s448_s27, %s568_s3 }
 0x1fa   :  { %p454_p3 = pnand %p452_p2, %p449_p1 }
 0x1fc   :  { %457 = shalt.err (!%p454_p3)
}
 0x1fd   :  { %299 = dma.vmem_to_hbm [thread:$0]  %s294_s21, 1536, %s568_s3, [#allocation4], %s466_s24, %s466_s24, %s467_s25  }
 0x1fe   :  { %462 = dma.done.wait [#allocation4], 1536  }
 0x1ff   :  { %463 = vsyncadd [#allocation4], 4294965760 }
 0x200   :  { %303 = vsyncpa [#allocation3], 1 }
 0x201   :  { %304 = vsyncpa [#allocation6], 1 }
 0x202   :  { %305 = vsyncpa [#allocation4], 1 }

</bundles_post_ra>
